<compile_context>
chip_gen: v6e
topology: v6e:2x2x1
jax: 0.10.0
libtpu: 0.0.40
codegen_flags: <defaults>
</compile_context>

<pallas_src>
import functools

import jax
import jax.numpy as jnp
import numpy as np
from jax.experimental import pallas as pl
from jax.experimental.pallas import tpu as pltpu

HALO_W = 128  # lanes of raw-input history staged per tile (>= receptive field 14)


def _round_up(x, m):
    return (x + m - 1) // m * m


# ----------------------------- fused Pallas kernel ---------------------------

def _fused_decoder_kernel(xh_ref, xc_ref,
                          w1_ref, b1_ref, w2_ref, b2_ref, w3_ref, b3_ref,
                          wfc_ref, bfc_ref, o_ref,
                          x_sc, h1_sc, h2_sc,
                          *, tt, dilations):
    """One (batch, time-tile) step of the whole decoder, (C, T) layout.

    xh_ref : (1, z, 128)  last 128 time lanes of the previous tile (zeros @ tile 0)
    xc_ref : (1, z, tt)   current input tile
    w*_ref : (Cout, 3*Cin) conv weights, taps [t-2d, t-d, t] stacked along K
    b*_ref : (Cout, 1)
    wfc/bfc: (n_in, n_in) / (n_in, 1) final Linear
    o_ref  : (1, n_in, tt) lane-dense output tile
    x_sc   : (z, 128+tt)   staged raw-input span; h1_sc/h2_sc: halo'd activations
    """
    d1, d2, d3 = dilations
    need1 = 2 * (d2 + d3)          # history lanes layer-1 output carries (12)
    need2 = 2 * d3                 # history lanes layer-2 output carries (8)
    n1 = tt + need1
    n2 = tt + need2
    i = pl.program_id(1)

    # Stage halo + current tile contiguously (both stores lane-aligned).
    x_sc[:, pl.ds(0, HALO_W)] = xh_ref[0]
    x_sc[:, pl.ds(HALO_W, tt)] = xc_ref[0]

    def conv_relu(src, w_ref, b_ref, d, src_off, n_out):
        """Causal dilated conv (k=3) + bias + ReLU as ONE merged-tap matmul."""
        taps = [src[:, pl.ds(src_off + j * d, n_out)] for j in range(3)]
        xt = jnp.concatenate(taps, axis=0)                     # (3*Cin, n_out)
        y = jnp.dot(w_ref[...], xt, preferred_element_type=jnp.float32)
        return jnp.maximum(y + b_ref[...], 0.0)

    # layer 1 (d=1): output span covers [t0-need1, t0+tt)
    h1_sc[...] = conv_relu(x_sc, w1_ref, b1_ref, d1,
                           HALO_W - need1 - 2 * d1, n1)

    @pl.when(i == 0)
    def _():  # lanes at absolute time < 0 stand in for the reference zero pad
        h1_sc[:, pl.ds(0, need1)] = jnp.zeros(
            (h1_sc.shape[0], need1), jnp.float32)

    # layer 2 (d=2): output span covers [t0-need2, t0+tt)
    h2_sc[...] = conv_relu(h1_sc, w2_ref, b2_ref, d2, 0, n2)

    @pl.when(i == 0)
    def _():
        h2_sc[:, pl.ds(0, need2)] = jnp.zeros(
            (h2_sc.shape[0], need2), jnp.float32)

    # layer 3 (d=4): exactly the tile
    h3 = conv_relu(h2_sc, w3_ref, b3_ref, d3, 0, tt)           # (n_in, tt)

    # fused Linear + sigmoid, lane-dense (n_in, tt) store
    y = jnp.dot(wfc_ref[...], h3, preferred_element_type=jnp.float32)
    o_ref[0] = jax.nn.sigmoid(y + bfc_ref[...]).astype(o_ref.dtype)


# ----------------------------- wrapper ---------------------------------------

def decoder_forward(x_in, params, *, time_tile=2048):
    """x_in: (B, T, z_dim) float32 -> (B, T, n_in) float32 (single pallas_call)."""
    B, T, z_dim = x_in.shape
    dilations = (1, 2, 4)
    K = 3
    need1 = 2 * (dilations[1] + dilations[2])      # 12
    need2 = 2 * dilations[2]                       # 8

    # Conv weights: (Cout, Cin, 3) -> (Cout, 3*Cin); taps stacked [t-2d, t-d, t].
    conv_ws, conv_bs = [], []
    for w, b in zip(params["kernels"], params["biases"]):
        cout, cin, k = w.shape
        assert k == K
        conv_ws.append(jnp.transpose(w, (0, 2, 1)).reshape(cout, K * cin)
                       .astype(jnp.float32))
        conv_bs.append(b.reshape(cout, 1).astype(jnp.float32))
    c1 = conv_ws[0].shape[0]
    c2 = conv_ws[1].shape[0]
    n_in = params["fc_w"].shape[0]
    wfc = params["fc_w"].astype(jnp.float32)               # (out, in)
    bfc = params["fc_b"].reshape(n_in, 1).astype(jnp.float32)

    # Time tile: multiple of 128 (lane-dense stores, aligned halo blocks).
    tt = max(HALO_W, min(_round_up(time_tile, HALO_W), _round_up(T, HALO_W)))
    # Keep >= 2 parallel grid steps when possible (v7x has 2 TensorCores).
    if B == 1 and T > HALO_W:
        tt = min(tt, _round_up((T + 1) // 2, HALO_W))
    T_p = _round_up(T, tt)
    n_t = T_p // tt

    # channels -> sublanes, time -> lanes; end-pad time (causal => harmless).
    x_ct = jnp.transpose(x_in.astype(jnp.float32), (0, 2, 1))       # (B, z, T)
    x_main = jnp.pad(x_ct, ((0, 0), (0, 0), (0, T_p - T)))          # (B, z, T_p)

    # Per-tile halo source: last HALO_W lanes of the previous tile (zeros @ 0).
    tails = x_main.reshape(B, z_dim, n_t, tt)[..., tt - HALO_W:]
    halo_src = jnp.concatenate(
        [jnp.zeros((B, z_dim, 1, HALO_W), jnp.float32), tails[:, :, :-1, :]],
        axis=2).reshape(B, z_dim, n_t * HALO_W)

    kernel = functools.partial(_fused_decoder_kernel, tt=tt, dilations=dilations)

    def _full2d(a):
        return pl.BlockSpec(a.shape, lambda b, i: (0, 0))

    out_ct = pl.pallas_call(
        kernel,
        out_shape=jax.ShapeDtypeStruct((B, n_in, T_p), jnp.float32),
        grid=(B, n_t),
        in_specs=[
            pl.BlockSpec((1, z_dim, HALO_W), lambda b, i: (b, 0, i)),  # halo
            pl.BlockSpec((1, z_dim, tt), lambda b, i: (b, 0, i)),      # tile
            _full2d(conv_ws[0]), _full2d(conv_bs[0]),
            _full2d(conv_ws[1]), _full2d(conv_bs[1]),
            _full2d(conv_ws[2]), _full2d(conv_bs[2]),
            _full2d(wfc), _full2d(bfc),
        ],
        out_specs=pl.BlockSpec((1, n_in, tt), lambda b, i: (b, 0, i)),
        scratch_shapes=[
            pltpu.VMEM((z_dim, HALO_W + tt), jnp.float32),   # staged input span
            pltpu.VMEM((c1, tt + need1), jnp.float32),       # layer-1 activations
            pltpu.VMEM((c2, tt + need2), jnp.float32),       # layer-2 activations
        ],
        compiler_params=pltpu.CompilerParams(
            dimension_semantics=("parallel", "parallel")),
    )(halo_src, x_main, conv_ws[0], conv_bs[0], conv_ws[1], conv_bs[1],
      conv_ws[2], conv_bs[2], wfc, bfc)

    # Tiny wrapper-side transpose back to (B, T, n_in).
    return jnp.transpose(out_ct[:, :, :T], (0, 2, 1))


# ----------------------------- pure-JAX reference ----------------------------

def decoder_reference(x_in, params):
    dilations = (1, 2, 4)
    kernels = params["kernels"]
    x = jnp.transpose(x_in, (0, 2, 1))          # NCW, like PyTorch
    y = x
    for layer, w in enumerate(kernels):
        d = dilations[layer]
        k = w.shape[2]
        pad = (k - 1) * d
        y = jax.lax.conv_general_dilated(
            x, w, window_strides=(1,), padding=[(pad, pad)],
            rhs_dilation=(d,), dimension_numbers=("NCH", "OIH", "NCH"))
        y = y + params["biases"][layer][None, :, None]
        y = y[:, :, : y.shape[2] - pad]
        if layer + 1 == len(kernels):
            y = jnp.transpose(y, (0, 2, 1))
            y = jnp.maximum(y, 0.0)
            y = y @ params["fc_w"].T + params["fc_b"]
            y = jax.nn.sigmoid(y)
        else:
            y = jnp.maximum(y, 0.0)
        x = y
    return y


# ----------------------------- param init ------------------------------------

def init_params(key, n_in, hidden_dim, z_dim):
    decoder_kernels = [(hidden_dim, z_dim, 3),
                       (hidden_dim, hidden_dim, 3),
                       (n_in, hidden_dim, 3)]
    keys = jax.random.split(key, 2 * len(decoder_kernels) + 2)
    kernels = [0.05 * jax.random.normal(keys[i], shape, dtype=jnp.float32)
               for i, shape in enumerate(decoder_kernels)]
    biases = [0.05 * jax.random.normal(keys[3 + i], (shape[0],),
                                       dtype=jnp.float32)
              for i, shape in enumerate(decoder_kernels)]
    bound = 1.0 / np.sqrt(n_in)
    fc_w = jax.random.uniform(keys[6], (n_in, n_in), jnp.float32,
                              minval=-bound, maxval=bound)
    fc_b = jax.random.uniform(keys[7], (n_in,), jnp.float32,
                              minval=-bound, maxval=bound)
    return {"kernels": kernels, "biases": biases, "fc_w": fc_w, "fc_b": fc_b}


# ----------------------------- main -------------------------------------------

if __name__ == "__main__":
    n_in, hidden_dim, z_dim = 16, 32, 8
    root = jax.random.PRNGKey(0)
    k_params, k_x1, k_x2, k_x3 = jax.random.split(root, 4)
    params = init_params(k_params, n_in, hidden_dim, z_dim)

    # Test 1: small sequence, single time tile (B=2, T=16).
    x1 = jax.random.normal(k_x1, (2, 16, z_dim), dtype=jnp.float32)
    fwd = jax.jit(decoder_forward)
    out1 = jax.block_until_ready(fwd(x1, params))
    ref1 = jax.block_until_ready(decoder_reference(x1, params))
    assert out1.shape == (2, 16, n_in), out1.shape
    np.testing.assert_allclose(np.asarray(out1), np.asarray(ref1),
                               rtol=1e-5, atol=1e-5)

    # Test 2: multi-tile halo + tile-0 masking path, non-divisible T
    # (B=2, T=300, time tile 128 -> grid (2, 3)).
    x2 = jax.random.normal(k_x2, (2, 300, z_dim), dtype=jnp.float32)
    fwd_small = jax.jit(functools.partial(decoder_forward, time_tile=128))
    out2 = jax.block_until_ready(fwd_small(x2, params))
    ref2 = jax.block_until_ready(decoder_reference(x2, params))
    assert out2.shape == (2, 300, n_in), out2.shape
    np.testing.assert_allclose(np.asarray(out2), np.asarray(ref2),
                               rtol=1e-5, atol=1e-5)

    # Test 3: B=1 path where the wrapper auto-splits time so the grid still
    # exposes >= 2 parallel steps (v7x dual-TensorCore).
    x3 = jax.random.normal(k_x3, (1, 260, z_dim), dtype=jnp.float32)
    out3 = jax.block_until_ready(jax.jit(decoder_forward)(x3, params))
    ref3 = jax.block_until_ready(decoder_reference(x3, params))
    assert out3.shape == (1, 260, n_in), out3.shape
    np.testing.assert_allclose(np.asarray(out3), np.asarray(ref3),
                               rtol=1e-5, atol=1e-5)

    print("KERNEL_OK")
</pallas_src>

<mosaic_0001>
module attributes {stable_mosaic.version = 11 : i64} {
  func.func @_fused_decoder_kernel(%arg0: i32, %arg1: i32, %arg2: memref<1x8x128xf32, #tpu.memory_space<vmem>>, %arg3: memref<1x8x128xf32, #tpu.memory_space<vmem>>, %arg4: memref<32x24xf32, #tpu.memory_space<vmem>>, %arg5: memref<32x1xf32, #tpu.memory_space<vmem>>, %arg6: memref<32x96xf32, #tpu.memory_space<vmem>>, %arg7: memref<32x1xf32, #tpu.memory_space<vmem>>, %arg8: memref<16x96xf32, #tpu.memory_space<vmem>>, %arg9: memref<16x1xf32, #tpu.memory_space<vmem>>, %arg10: memref<16x16xf32, #tpu.memory_space<vmem>>, %arg11: memref<16x1xf32, #tpu.memory_space<vmem>>, %arg12: memref<1x16x128xf32, #tpu.memory_space<vmem>>, %arg13: memref<8x256xf32, #tpu.memory_space<vmem>>, %arg14: memref<32x140xf32, #tpu.memory_space<vmem>>, %arg15: memref<32x136xf32, #tpu.memory_space<vmem>>) attributes {dimension_semantics = [#tpu.dimension_semantics<parallel>, #tpu.dimension_semantics<parallel>], iteration_bounds = array<i64: 2, 1>, scalar_prefetch = 0 : i64, scratch_operands = 3 : i64, tpu.core_type = #tpu.core_type<tc>, window_params = [{transform_indices = @transform_0, window_bounds = array<i64: 1, 8, 128>}, {transform_indices = @transform_1, window_bounds = array<i64: 1, 8, 128>}, {pipeline_mode = #tpu.pipeline_mode<synchronous>, transform_indices = @transform_2, window_bounds = array<i64: 32, 24>}, {pipeline_mode = #tpu.pipeline_mode<synchronous>, transform_indices = @transform_3, window_bounds = array<i64: 32, 1>}, {pipeline_mode = #tpu.pipeline_mode<synchronous>, transform_indices = @transform_4, window_bounds = array<i64: 32, 96>}, {pipeline_mode = #tpu.pipeline_mode<synchronous>, transform_indices = @transform_5, window_bounds = array<i64: 32, 1>}, {pipeline_mode = #tpu.pipeline_mode<synchronous>, transform_indices = @transform_6, window_bounds = array<i64: 16, 96>}, {pipeline_mode = #tpu.pipeline_mode<synchronous>, transform_indices = @transform_7, window_bounds = array<i64: 16, 1>}, {pipeline_mode = #tpu.pipeline_mode<synchronous>, transform_indices = @transform_8, window_bounds = array<i64: 16, 16>}, {pipeline_mode = #tpu.pipeline_mode<synchronous>, transform_indices = @transform_9, window_bounds = array<i64: 16, 1>}, {transform_indices = @transform_10, window_bounds = array<i64: 1, 16, 128>}]} {
    %c0 = arith.constant 0 : index
    %c0_0 = arith.constant 0 : index
    %c0_1 = arith.constant 0 : index
    %0 = vector.load %arg2[%c0, %c0_0, %c0_1] : memref<1x8x128xf32, #tpu.memory_space<vmem>>, vector<1x8x128xf32>
    %1 = vector.shape_cast %0 : vector<1x8x128xf32> to vector<8x128xf32>
    %c0_2 = arith.constant 0 : index
    %c0_3 = arith.constant 0 : index
    %2 = vector.load %arg13[%c0_2, %c0_3] : memref<8x256xf32, #tpu.memory_space<vmem>>, vector<8x128xf32>
    tpu.vector_store %arg13[%c0_2, %c0_3], %1 {strides = array<i32>} : memref<8x256xf32, #tpu.memory_space<vmem>>, vector<8x128xf32>,
    %c0_4 = arith.constant 0 : index
    %c0_5 = arith.constant 0 : index
    %c0_6 = arith.constant 0 : index
    %3 = vector.load %arg3[%c0_4, %c0_5, %c0_6] : memref<1x8x128xf32, #tpu.memory_space<vmem>>, vector<1x8x128xf32>
    %4 = vector.shape_cast %3 : vector<1x8x128xf32> to vector<8x128xf32>
    %c0_7 = arith.constant 0 : index
    %c128 = arith.constant 128 : index
    %5 = vector.load %arg13[%c0_7, %c128] : memref<8x256xf32, #tpu.memory_space<vmem>>, vector<8x128xf32>
    tpu.vector_store %arg13[%c0_7, %c128], %4 {strides = array<i32>} : memref<8x256xf32, #tpu.memory_space<vmem>>, vector<8x128xf32>,
    %c0_8 = arith.constant 0 : index
    %c114 = arith.constant 114 : index
    %6 = vector.load %arg13[%c0_8, %c114] : memref<8x256xf32, #tpu.memory_space<vmem>>, vector<8x140xf32>
    %c0_9 = arith.constant 0 : index
    %c115 = arith.constant 115 : index
    %7 = vector.load %arg13[%c0_9, %c115] : memref<8x256xf32, #tpu.memory_space<vmem>>, vector<8x140xf32>
    %c0_10 = arith.constant 0 : index
    %c116 = arith.constant 116 : index
    %8 = vector.load %arg13[%c0_10, %c116] : memref<8x256xf32, #tpu.memory_space<vmem>>, vector<8x140xf32>
    %9 = tpu.concatenate %6, %7, %8 in 0 : vector<8x140xf32>, vector<8x140xf32>, vector<8x140xf32> -> vector<24x140xf32>
    %c0_11 = arith.constant 0 : index
    %c0_12 = arith.constant 0 : index
    %10 = vector.load %arg4[%c0_11, %c0_12] : memref<32x24xf32, #tpu.memory_space<vmem>>, vector<32x24xf32>
    %cst = arith.constant dense<0.000000e+00> : vector<32x140xf32>
    %11 = tpu.matmul %10, %9, %cst {dimension_numbers = #tpu.dot_dimension_numbers<[1], [0], [0], [1], [0, 0, 1, 1], [], []>} : vector<32x24xf32>, vector<24x140xf32>, vector<32x140xf32> -> vector<32x140xf32>
    %c0_13 = arith.constant 0 : index
    %c0_14 = arith.constant 0 : index
    %12 = vector.load %arg5[%c0_13, %c0_14] : memref<32x1xf32, #tpu.memory_space<vmem>>, vector<32x1xf32>
    %13 = vector.broadcast %12 : vector<32x1xf32> to vector<32x140xf32>
    %14 = arith.addf %11, %13 : vector<32x140xf32>
    %cst_15 = arith.constant 0.000000e+00 : f32
    %15 = vector.broadcast %cst_15 : f32 to vector<32x140xf32>
    %16 = arith.maximumf %14, %15 : vector<32x140xf32>
    %c0_16 = arith.constant 0 : index
    %c0_17 = arith.constant 0 : index
    %17 = vector.load %arg14[%c0_16, %c0_17] : memref<32x140xf32, #tpu.memory_space<vmem>>, vector<32x140xf32>
    tpu.vector_store %arg14[%c0_16, %c0_17], %16 {strides = array<i32>} : memref<32x140xf32, #tpu.memory_space<vmem>>, vector<32x140xf32>,
    %c0_i32 = arith.constant 0 : i32
    %18 = arith.cmpi eq, %arg1, %c0_i32 : i32
    %19 = arith.extui %18 : i1 to i32
    %c0_i32_18 = arith.constant 0 : i32
    %20 = arith.cmpi ne, %19, %c0_i32_18 : i32
    scf.if %20 {
      %cst_53 = arith.constant 0.000000e+00 : f32
      %60 = vector.broadcast %cst_53 : f32 to vector<32x12xf32>
      %c0_54 = arith.constant 0 : index
      %c0_55 = arith.constant 0 : index
      %61 = vector.load %arg14[%c0_54, %c0_55] : memref<32x140xf32, #tpu.memory_space<vmem>>, vector<32x12xf32>
      tpu.vector_store %arg14[%c0_54, %c0_55], %60 {strides = array<i32>} : memref<32x140xf32, #tpu.memory_space<vmem>>, vector<32x12xf32>,
    } else {
    }
    %c0_19 = arith.constant 0 : index
    %c0_20 = arith.constant 0 : index
    %21 = vector.load %arg14[%c0_19, %c0_20] : memref<32x140xf32, #tpu.memory_space<vmem>>, vector<32x136xf32>
    %c0_21 = arith.constant 0 : index
    %c2 = arith.constant 2 : index
    %22 = vector.load %arg14[%c0_21, %c2] : memref<32x140xf32, #tpu.memory_space<vmem>>, vector<32x136xf32>
    %c0_22 = arith.constant 0 : index
    %c4 = arith.constant 4 : index
    %23 = vector.load %arg14[%c0_22, %c4] : memref<32x140xf32, #tpu.memory_space<vmem>>, vector<32x136xf32>
    %24 = tpu.concatenate %21, %22, %23 in 0 : vector<32x136xf32>, vector<32x136xf32>, vector<32x136xf32> -> vector<96x136xf32>
    %c0_23 = arith.constant 0 : index
    %c0_24 = arith.constant 0 : index
    %25 = vector.load %arg6[%c0_23, %c0_24] : memref<32x96xf32, #tpu.memory_space<vmem>>, vector<32x96xf32>
    %cst_25 = arith.constant dense<0.000000e+00> : vector<32x136xf32>
    %26 = tpu.matmul %25, %24, %cst_25 {dimension_numbers = #tpu.dot_dimension_numbers<[1], [0], [0], [1], [0, 0, 1, 1], [], []>} : vector<32x96xf32>, vector<96x136xf32>, vector<32x136xf32> -> vector<32x136xf32>
    %c0_26 = arith.constant 0 : index
    %c0_27 = arith.constant 0 : index
    %27 = vector.load %arg7[%c0_26, %c0_27] : memref<32x1xf32, #tpu.memory_space<vmem>>, vector<32x1xf32>
    %28 = vector.broadcast %27 : vector<32x1xf32> to vector<32x136xf32>
    %29 = arith.addf %26, %28 : vector<32x136xf32>
    %cst_28 = arith.constant 0.000000e+00 : f32
    %30 = vector.broadcast %cst_28 : f32 to vector<32x136xf32>
    %31 = arith.maximumf %29, %30 : vector<32x136xf32>
    %c0_29 = arith.constant 0 : index
    %c0_30 = arith.constant 0 : index
    %32 = vector.load %arg15[%c0_29, %c0_30] : memref<32x136xf32, #tpu.memory_space<vmem>>, vector<32x136xf32>
    tpu.vector_store %arg15[%c0_29, %c0_30], %31 {strides = array<i32>} : memref<32x136xf32, #tpu.memory_space<vmem>>, vector<32x136xf32>,
    %c0_i32_31 = arith.constant 0 : i32
    %33 = arith.cmpi eq, %arg1, %c0_i32_31 : i32
    %34 = arith.extui %33 : i1 to i32
    %c0_i32_32 = arith.constant 0 : i32
    %35 = arith.cmpi ne, %34, %c0_i32_32 : i32
    scf.if %35 {
      %cst_53 = arith.constant 0.000000e+00 : f32
      %60 = vector.broadcast %cst_53 : f32 to vector<32x8xf32>
      %c0_54 = arith.constant 0 : index
      %c0_55 = arith.constant 0 : index
      %61 = vector.load %arg15[%c0_54, %c0_55] : memref<32x136xf32, #tpu.memory_space<vmem>>, vector<32x8xf32>
      tpu.vector_store %arg15[%c0_54, %c0_55], %60 {strides = array<i32>} : memref<32x136xf32, #tpu.memory_space<vmem>>, vector<32x8xf32>,
    } else {
    }
    %c0_33 = arith.constant 0 : index
    %c0_34 = arith.constant 0 : index
    %36 = vector.load %arg15[%c0_33, %c0_34] : memref<32x136xf32, #tpu.memory_space<vmem>>, vector<32x128xf32>
    %c0_35 = arith.constant 0 : index
    %c4_36 = arith.constant 4 : index
    %37 = vector.load %arg15[%c0_35, %c4_36] : memref<32x136xf32, #tpu.memory_space<vmem>>, vector<32x128xf32>
    %c0_37 = arith.constant 0 : index
    %c8 = arith.constant 8 : index
    %38 = vector.load %arg15[%c0_37, %c8] : memref<32x136xf32, #tpu.memory_space<vmem>>, vector<32x128xf32>
    %39 = tpu.concatenate %36, %37, %38 in 0 : vector<32x128xf32>, vector<32x128xf32>, vector<32x128xf32> -> vector<96x128xf32>
    %c0_38 = arith.constant 0 : index
    %c0_39 = arith.constant 0 : index
    %40 = vector.load %arg8[%c0_38, %c0_39] : memref<16x96xf32, #tpu.memory_space<vmem>>, vector<16x96xf32>
    %cst_40 = arith.constant dense<0.000000e+00> : vector<16x128xf32>
    %41 = tpu.matmul %40, %39, %cst_40 {dimension_numbers = #tpu.dot_dimension_numbers<[1], [0], [0], [1], [0, 0, 1, 1], [], []>} : vector<16x96xf32>, vector<96x128xf32>, vector<16x128xf32> -> vector<16x128xf32>
    %c0_41 = arith.constant 0 : index
    %c0_42 = arith.constant 0 : index
    %42 = vector.load %arg9[%c0_41, %c0_42] : memref<16x1xf32, #tpu.memory_space<vmem>>, vector<16x1xf32>
    %43 = vector.broadcast %42 : vector<16x1xf32> to vector<16x128xf32>
    %44 = arith.addf %41, %43 : vector<16x128xf32>
    %cst_43 = arith.constant 0.000000e+00 : f32
    %45 = vector.broadcast %cst_43 : f32 to vector<16x128xf32>
    %46 = arith.maximumf %44, %45 : vector<16x128xf32>
    %c0_44 = arith.constant 0 : index
    %c0_45 = arith.constant 0 : index
    %47 = vector.load %arg10[%c0_44, %c0_45] : memref<16x16xf32, #tpu.memory_space<vmem>>, vector<16x16xf32>
    %cst_46 = arith.constant dense<0.000000e+00> : vector<16x128xf32>
    %48 = tpu.matmul %47, %46, %cst_46 {dimension_numbers = #tpu.dot_dimension_numbers<[1], [0], [0], [1], [0, 0, 1, 1], [], []>} : vector<16x16xf32>, vector<16x128xf32>, vector<16x128xf32> -> vector<16x128xf32>
    %c0_47 = arith.constant 0 : index
    %c0_48 = arith.constant 0 : index
    %49 = vector.load %arg11[%c0_47, %c0_48] : memref<16x1xf32, #tpu.memory_space<vmem>>, vector<16x1xf32>
    %50 = vector.broadcast %49 : vector<16x1xf32> to vector<16x128xf32>
    %51 = arith.addf %48, %50 : vector<16x128xf32>
    %52 = arith.negf %51 : vector<16x128xf32>
    %53 = math.exp %52 : vector<16x128xf32>
    %cst_49 = arith.constant 1.000000e+00 : f32
    %54 = vector.broadcast %cst_49 : f32 to vector<16x128xf32>
    %55 = arith.addf %54, %53 : vector<16x128xf32>
    %56 = arith.divf %54, %55 : vector<16x128xf32>
    %c0_50 = arith.constant 0 : index
    %c0_51 = arith.constant 0 : index
    %c0_52 = arith.constant 0 : index
    %57 = vector.load %arg12[%c0_50, %c0_51, %c0_52] : memref<1x16x128xf32, #tpu.memory_space<vmem>>, vector<1x16x128xf32>
    %58 = vector.shape_cast %57 : vector<1x16x128xf32> to vector<16x128xf32>
    %59 = vector.shape_cast %56 : vector<16x128xf32> to vector<1x16x128xf32>
    tpu.vector_store %arg12[%c0_50, %c0_51, %c0_52], %59 {strides = array<i32>} : memref<1x16x128xf32, #tpu.memory_space<vmem>>, vector<1x16x128xf32>,
    return
  }
  func.func @transform_0(%arg0: i32, %arg1: i32) -> (i32, i32, i32) {
    %c0_i32 = arith.constant 0 : i32
    %c0_i32_0 = arith.constant 0 : i32
    return %arg0, %c0_i32, %arg1 : i32, i32, i32
  }
  func.func @transform_1(%arg0: i32, %arg1: i32) -> (i32, i32, i32) {
    %c0_i32 = arith.constant 0 : i32
    %c0_i32_0 = arith.constant 0 : i32
    return %arg0, %c0_i32, %arg1 : i32, i32, i32
  }
  func.func @transform_2(%arg0: i32, %arg1: i32) -> (i32, i32) {
    %c0_i32 = arith.constant 0 : i32
    %c0_i32_0 = arith.constant 0 : i32
    %c0_i32_1 = arith.constant 0 : i32
    return %c0_i32, %c0_i32_0 : i32, i32
  }
  func.func @transform_3(%arg0: i32, %arg1: i32) -> (i32, i32) {
    %c0_i32 = arith.constant 0 : i32
    %c0_i32_0 = arith.constant 0 : i32
    %c0_i32_1 = arith.constant 0 : i32
    return %c0_i32, %c0_i32_0 : i32, i32
  }
  func.func @transform_4(%arg0: i32, %arg1: i32) -> (i32, i32) {
    %c0_i32 = arith.constant 0 : i32
    %c0_i32_0 = arith.constant 0 : i32
    %c0_i32_1 = arith.constant 0 : i32
    return %c0_i32, %c0_i32_0 : i32, i32
  }
  func.func @transform_5(%arg0: i32, %arg1: i32) -> (i32, i32) {
    %c0_i32 = arith.constant 0 : i32
    %c0_i32_0 = arith.constant 0 : i32
    %c0_i32_1 = arith.constant 0 : i32
    return %c0_i32, %c0_i32_0 : i32, i32
  }
  func.func @transform_6(%arg0: i32, %arg1: i32) -> (i32, i32) {
    %c0_i32 = arith.constant 0 : i32
    %c0_i32_0 = arith.constant 0 : i32
    %c0_i32_1 = arith.constant 0 : i32
    return %c0_i32, %c0_i32_0 : i32, i32
  }
  func.func @transform_7(%arg0: i32, %arg1: i32) -> (i32, i32) {
    %c0_i32 = arith.constant 0 : i32
    %c0_i32_0 = arith.constant 0 : i32
    %c0_i32_1 = arith.constant 0 : i32
    return %c0_i32, %c0_i32_0 : i32, i32
  }
  func.func @transform_8(%arg0: i32, %arg1: i32) -> (i32, i32) {
    %c0_i32 = arith.constant 0 : i32
    %c0_i32_0 = arith.constant 0 : i32
    %c0_i32_1 = arith.constant 0 : i32
    return %c0_i32, %c0_i32_0 : i32, i32
  }
  func.func @transform_9(%arg0: i32, %arg1: i32) -> (i32, i32) {
    %c0_i32 = arith.constant 0 : i32
    %c0_i32_0 = arith.constant 0 : i32
    %c0_i32_1 = arith.constant 0 : i32
    return %c0_i32, %c0_i32_0 : i32, i32
  }
  func.func @transform_10(%arg0: i32, %arg1: i32) -> (i32, i32, i32) {
    %c0_i32 = arith.constant 0 : i32
    %c0_i32_0 = arith.constant 0 : i32
    return %arg0, %c0_i32, %arg1 : i32, i32, i32
  }
}

</mosaic_0001>

<bundles_post_ra>
// kernel: decoder_forward.1
= control target key start
LH: loop header
LB: loop body
LE: loop exit
PB: predicated region body
PF: predicated region fallthrough
CT: control target
= control target key end

     0   :  { %s1412_s13 = smov 0   ;;  %s1414_s14 = smov 0   ;;  %s1658_s0 = inlined_call_operand.vmem [shape: f32[2,8,128], index: 0, kind: input, shape index: {}]   ;;  %s1659_s1 = inlined_call_operand.vmem [shape: f32[2,8,128], index: 1, kind: input, shape index: {}]   ;;  %s1660_s2 = inlined_call_operand.vmem [shape: f32[32,24], index: 2, kind: input, shape index: {}]   ;;  %s1661_s3 = inlined_call_operand.vmem [shape: f32[32,1], index: 3, kind: input, shape index: {}]   ;;  %s1662_s4 = inlined_call_operand.vmem [shape: f32[32,96], index: 4, kind: input, shape index: {}]   ;;  %s1663_s5 = inlined_call_operand.vmem [shape: f32[32,1], index: 5, kind: input, shape index: {}]   ;;  %s1664_s6 = inlined_call_operand.vmem [shape: f32[16,96], index: 6, kind: input, shape index: {}]   ;;  %s1665_s7 = inlined_call_operand.vmem [shape: f32[16,1], index: 7, kind: input, shape index: {}]   ;;  %s1666_s8 = inlined_call_operand.vmem [shape: f32[16,16], index: 8, kind: input, shape index: {}]   ;;  %s1667_s9 = inlined_call_operand.vmem [shape: f32[16,1], index: 9, kind: input, shape index: {}]   ;;  %s1668_s10 = inlined_call_operand.vmem [shape: f32[2,16,128], index: 10, kind: output, shape index: {}]  }
   0x1   :  { %s1416_s15 = smov 0  }
   0x2 LB: > { %s32_s16 = sadd.s32 1, %s1344_s14  ;;  %p1211_p0 = scmp.ge.s32.totalorder %s1348_s15, 1  ;;  %s1348_s15 = sphi %s1416_s15, %s20_s15   ;;  %s1344_s14 = sphi %s1414_s14, %s1670_s14   ;;  %s1340_s13 = sphi %s1412_s13, %s1669_s13  }
   0x3   : > { %p34_p1 = scmp.ge.s32.totalorder %s32_s16, 2  ;;  %p344_p2 = scmp.lt.s32.totalorder %s1348_s15, 3 }
   0x5   : > { %s1672_s16 = smov (%p34_p1, %s32_s16), 0  ;;  %p345_p3 = pnand %p1211_p0, %p344_p2 }
   0x6   : > { %p394_p4 = scmp.lt.s32.totalorder (!%p345_p3), %s1340_s13, 1  ;;  %s1350_s24 = smov (!%p345_p3), 127  }
   0x7   : > { %348 = sbr.rel (%p345_p3) target bundleno = 1413 (0x585), region = 60  ;;  %s1351_s25 = smov (!%p345_p3), 126  }
   0x8   : > { %s1353_s26 = smov (!%p345_p3), 14   ;;  %s1355_s28 = smov (!%p345_p3), 124  }
   0x9   : > { %s1356_s30 = smov (!%p345_p3), 120  }
   0xc   : > { %s1674_s13 = smov (!%p394_p4, %s1340_s13), 1  ;;  %vm434_vm0 = vcmask 1031168   ;;  %v1352_v4 = vmov 0.0   ;;  %vm428_vm1 = vcmask 1039360   ;;  %v443_v9 = vld [vmem:[%s1661_s3 + $0x18] sm:$0xff]  ;;  %v442_v10 = vld [vmem:[%s1661_s3 + $0x10] sm:$0xff] }
   0xd   : > { %s1212_s17 = sshll.u32 %s1674_s13, 3  ;;  %563 = vmatprep.mubr.f32.mxu0 %v1352_v4  ;;  %791 = vmatprep.mubr.f32.mxu1 %v1352_v4  ;;  %v1354_v11 = vmov 0   ;;  %v441_v12 = vld [vmem:[%s1661_s3 + $0x8] sm:$0xff]  ;;  %v440_v13 = vld [vmem:[%s1661_s3] sm:$0xff]  ;;  %vm476_vm2 = vcmask 113664   ;;  %vm486_vm3 = vcmask 195584  }
   0xe   : > { %s400_s20 = scalar_lea.vmem %s1658_s0, %s1212_s17  ;;  %s407_s23 = scalar_lea.vmem %s1659_s1, %s1212_s17  ;;  %1316 = vset.pattern.permute.xlu0 %v1354_v11  ;;  %1317 = vset.pattern.permute.xlu1 %v1354_v11  ;;  %v436_v22 = vld [vmem:[%s1660_s2] sm:$0xff]  ;;  %v437_v24 = vld [vmem:[%s1660_s2 + $0x8] sm:$0xff]  ;;  %v438_v25 = vld [vmem:[%s1660_s2 + $0x10] sm:$0xff]  ;;  %vm597_vm4 = vcmask 97280   ;;  %vm673_vm5 = vcmask 1014784   ;;  %vm714_vm6 = vcmask 785408  }
   0xf   : > { %v416_v0 = vld [vmem:[%s400_s20] sm:$0xff]  ;;  %v439_v26 = vld [vmem:[%s1660_s2 + $0x18] sm:$0xff]  ;;  %vm825_vm7 = vcmask 64512   ;;  %vm896_vm8 = vcmask 982016   ;;  %vm1016_vm9 = vcmask 130048   ;;  %s1232_s11 = sshll.u32 %s1674_s13, 4 }
  0x10   : > { %424 = vrot.lane.b32.xlu1 %v416_v0, %s1350_s24  ;;  %430 = vrot.lane.b32.xlu0 %v416_v0, %s1351_s25  ;;  %v418_v1 = vld [vmem:[%s407_s23] sm:$0xff]  ;;  %v693_v63 = vld [vmem:[%s1663_s5 + $0x18] sm:$0xff]  ;;  %s415_s18 = scalar_lea.vmem %s1668_s10, %s1232_s11 }
  0x14   : > { %426 = vrot.lane.b32.xlu1 %v418_v1, %s1350_s24  ;;  %432 = vrot.lane.b32.xlu0 %v418_v1, %s1351_s25 }
  0x82   : > { %v425_v2 = vpop.permute.xlu1 %424  ;;  %v431_v3 = vpop.permute.xlu0 %430 }
  0x86   : > { %v433_v5 = vpop.permute.xlu0 %432  ;;  %v427_v7 = vpop.permute.xlu1 %426 }
  0x87   : > { %474 = vrot.lane.b32.xlu1 %v433_v5, %s1353_s26  ;;  %v435_v6 = vsel %vm434_vm0, %v431_v3, %v433_v5  ;;  %v429_v8 = vsel %vm428_vm1, %v425_v2, %v427_v7  ;;  %v690_v2 = vld [vmem:[%s1663_s5] sm:$0xff] }
  0x88   : > { %472 = vrot.lane.b32.xlu0 %v435_v6, %s1353_s26 }
  0x8b   : > { %470 = vrot.lane.b32.xlu1 %v427_v7, %s1353_s26 }
  0x8c   : > { %468 = vrot.lane.b32.xlu0 %v429_v8, %s1353_s26 }
  0x8f   : > { %466 = vrot.lane.b32.xlu1 %v418_v1, %s1353_s26  ;;  %v691_v1 = vld [vmem:[%s1663_s5 + $0x8] sm:$0xff] }
  0x90   : > { %464 = vrot.lane.b32.xlu0 %v416_v0, %s1353_s26  ;;  %v692_v0 = vld [vmem:[%s1663_s5 + $0x10] sm:$0xff] }
  0x93   : > { %456 = vperm.xlu1 %1317, %v442_v10  }
  0x94   : > { %461 = vperm.xlu0 %1316, %v443_v9  }
  0x97   : > { %451 = vperm.xlu1 %1317, %v441_v12  }
  0x98   : > { %446 = vperm.xlu0 %1316, %v440_v13  }
  0xf9   : > { %v475_v14 = vpop.permute.xlu1 %474 }
  0xfa   : > { %v473_v15 = vpop.permute.xlu0 %472  ;;  %525 = vmatprep.subr.mxu0 %v475_v14 }
  0xfb   : > { %v479_v16 = vsel %vm476_vm2, %v473_v15, %v475_v14 }
  0xfc   : > { %526 = vmatpush1.msra.mxu0 %v479_v16 }
  0xfd   : > { %v471_v17 = vpop.permute.xlu1 %470 }
  0xfe   : > { %v469_v18 = vpop.permute.xlu0 %468  ;;  %527 = vmatprep.subr.mxu0 %v471_v17 }
  0xff   : > { %v478_v19 = vsel %vm476_vm2, %v469_v18, %v471_v17 }
 0x100   : > { %528 = vmatpush1.msra.mxu0 %v478_v19 }
 0x101   : > { %v467_v20 = vpop.permute.xlu1 %466 }
 0x102   : > { %v465_v21 = vpop.permute.xlu0 %464  ;;  %529 = vmatprep.subr.mxu0 %v467_v20 }
 0x103   : > { %v477_v23 = vsel %vm476_vm2, %v465_v21, %v467_v20 }
 0x104   : > { %530 = vmatpush1.msra.mxu0 %v477_v23 }
 0x105   : > { %1216 = vmatmul.mubr.msk.f32.vlgmr.msra.gmra.mxu0 %vm486_vm3, %v436_v22 }
 0x106   : > { %569 = vmatprep.mubr.f32.mxu0 %v1352_v4 }
 0x109   : > { %1217 = vmatmul.mubr.msk.f32.gmra.mxu0 %vm486_vm3, %v437_v24 }
 0x10a   : > { %575 = vmatprep.mubr.f32.mxu0 %v1352_v4 }
 0x10d   : > { %1218 = vmatmul.mubr.msk.f32.gmra.mxu0 %vm486_vm3, %v438_v25 }
 0x10e   : > { %581 = vmatprep.mubr.f32.mxu0 %v1352_v4  ;;  %v457_v28 = vpop.permute.xlu1 %456 }
 0x10f   : > { %v462_v27 = vpop.permute.xlu0 %461 }
 0x111   : > { %1219 = vmatmul.mubr.msk.f32.gmra.mxu0 %vm486_vm3, %v439_v26 }
 0x112   : > { %v452_v35 = vpop.permute.xlu1 %451 }
 0x113   : > { %v447_v29 = vpop.permute.xlu0 %446 }
 0x1c5   : > { %v565_v30 = vpop.f32.mrf.mxu0 }
 0x1c6   : > { %v566_v31 = vadd.f32 %v565_v30, %v447_v29  ;;  %v688_v30 = vld [vmem:[%s1662_s4 + $0x10] sm:$0xff] }
 0x1c7   : > { %v567_v32 = vpop.f32.mrf.mxu0 }
 0x1c8   : > { %v588_v33 = vmax.f32 %v566_v31, 0.0  ;;  %v568_v34 = vadd.f32 %v567_v32, %v447_v29  ;;  %v687_v29 = vld [vmem:[%s1662_s4 + $0x8] sm:$0xff]  ;;  %v689_v31 = vld [vmem:[%s1662_s4 + $0x18] sm:$0xff] }
 0x1c9   : > { %v571_v36 = vpop.f32.mrf.mxu0 }
 0x1ca   : > { %596 = vst [vmem:[#allocation3] sm:$0xff] %v588_v33  ;;  %v589_v37 = vmax.f32 %v568_v34, 0.0  ;;  %v572_v38 = vadd.f32 %v571_v36, %v452_v35 }
 0x1cb   : > { %609 = vst.msk [vmem:[#allocation3] sm:$0xff] %vm597_vm4, %v1352_v4  ;;  %v573_v39 = vpop.f32.mrf.mxu0 }
 0x1cc   : > { %598 = vst.msk [vmem:[#allocation3 + $0x8] sm:$0xff] %vm597_vm4, %v589_v37  ;;  %v590_v40 = vmax.f32 %v572_v38, 0.0  ;;  %v574_v41 = vadd.f32 %v573_v39, %v452_v35 }
 0x1cd   : > { %v577_v42 = vpop.f32.mrf.mxu0 }
 0x1ce   : > { %599 = vst [vmem:[#allocation3 + $0x10] sm:$0xff] %v590_v40  ;;  %v591_v43 = vmax.f32 %v574_v41, 0.0  ;;  %v578_v44 = vadd.f32 %v577_v42, %v457_v28 }
 0x1cf   : > { %610 = vst.msk [vmem:[#allocation3 + $0x10] sm:$0xff] %vm597_vm4, %v1352_v4  ;;  %v579_v45 = vpop.f32.mrf.mxu0 }
 0x1d0   : > { %600 = vst.msk [vmem:[#allocation3 + $0x18] sm:$0xff] %vm597_vm4, %v591_v43  ;;  %v592_v46 = vmax.f32 %v578_v44, 0.0  ;;  %v580_v47 = vadd.f32 %v579_v45, %v457_v28  ;;  %v686_v28 = vld [vmem:[%s1662_s4] sm:$0xff] }
 0x1d1   : > { %v583_v48 = vpop.f32.mrf.mxu0 }
 0x1d2   : > { %601 = vst [vmem:[#allocation3 + $0x20] sm:$0xff] %v592_v46  ;;  %v593_v49 = vmax.f32 %v580_v47, 0.0  ;;  %v584_v50 = vadd.f32 %v583_v48, %v462_v27  ;;  %v1480_v51 = vld [vmem:[#allocation3] sm:$0xff] }
 0x1d3   : > { %611 = vst.msk [vmem:[#allocation3 + $0x20] sm:$0xff] %vm597_vm4, %v1352_v4  ;;  %v585_v52 = vpop.f32.mrf.mxu0  ;;  %657 = vrot.lane.b32.xlu1 %v1480_v51, %s1355_s28  ;;  %v1486_v53 = vld [vmem:[#allocation3 + $0x8] sm:$0xff] }
 0x1d4   : > { %602 = vst.msk [vmem:[#allocation3 + $0x28] sm:$0xff] %vm597_vm4, %v593_v49  ;;  %v594_v54 = vmax.f32 %v584_v50, 0.0  ;;  %v586_v55 = vadd.f32 %v585_v52, %v462_v27  ;;  %659 = vrot.lane.b32.xlu0 %v1486_v53, %s1355_s28 }
 0x1d6   : > { %603 = vst [vmem:[#allocation3 + $0x30] sm:$0xff] %v594_v54  ;;  %v595_v56 = vmax.f32 %v586_v55, 0.0  ;;  %v1491_v57 = vld [vmem:[#allocation3 + $0x10] sm:$0xff] }
 0x1d7   : > { %612 = vst.msk [vmem:[#allocation3 + $0x30] sm:$0xff] %vm597_vm4, %v1352_v4  ;;  %661 = vrot.lane.b32.xlu1 %v1491_v57, %s1355_s28  ;;  %v1497_v58 = vld [vmem:[#allocation3 + $0x18] sm:$0xff] }
 0x1d8   : > { %604 = vst.msk [vmem:[#allocation3 + $0x38] sm:$0xff] %vm597_vm4, %v595_v56  ;;  %663 = vrot.lane.b32.xlu0 %v1497_v58, %s1355_s28 }
 0x1da   : > { %v1502_v59 = vld [vmem:[#allocation3 + $0x20] sm:$0xff] }
 0x1db   : > { %665 = vrot.lane.b32.xlu1 %v1502_v59, %s1355_s28  ;;  %v1506_v60 = vld [vmem:[#allocation3 + $0x28] sm:$0xff] }
 0x1dc   : > { %667 = vrot.lane.b32.xlu0 %v1506_v60, %s1355_s28 }
 0x1de   : > { %v619_v61 = vld [vmem:[#allocation3 + $0x30] sm:$0xff] }
 0x1df   : > { %669 = vrot.lane.b32.xlu1 %v619_v61, %s1355_s28  ;;  %v620_v62 = vld [vmem:[#allocation3 + $0x38] sm:$0xff] }
 0x1e0   : > { %671 = vrot.lane.b32.xlu0 %v620_v62, %s1355_s28 }
 0x1e3   : > { %637 = vrot.lane.b32.xlu1 %v1502_v59, %s1351_s25 }
 0x1e4   : > { %639 = vrot.lane.b32.xlu0 %v1506_v60, %s1351_s25 }
 0x1e7   : > { %641 = vrot.lane.b32.xlu1 %v619_v61, %s1351_s25 }
 0x1e8   : > { %643 = vrot.lane.b32.xlu0 %v620_v62, %s1351_s25 }
 0x1eb   : > { %633 = vrot.lane.b32.xlu1 %v1491_v57, %s1351_s25 }
 0x1ec   : > { %635 = vrot.lane.b32.xlu0 %v1497_v58, %s1351_s25 }
 0x1ef   : > { %629 = vrot.lane.b32.xlu1 %v1480_v51, %s1351_s25 }
 0x1f0   : > { %631 = vrot.lane.b32.xlu0 %v1486_v53, %s1351_s25 }
 0x1f3   : > { %711 = vperm.xlu1 %1317, %v693_v63  }
 0x1f4   : > { %706 = vperm.xlu0 %1316, %v692_v0  }
 0x1f7   : > { %701 = vperm.xlu1 %1317, %v691_v1  }
 0x1f8   : > { %696 = vperm.xlu0 %1316, %v690_v2  }
 0x245   : > { %v658_v3 = vpop.permute.xlu1 %657 }
 0x246   : > { %v660_v5 = vpop.permute.xlu0 %659 }
 0x247   : > { %v674_v17 = vsel %vm673_vm5, %v658_v3, %v660_v5 }
 0x249   : > { %v662_v6 = vpop.permute.xlu1 %661 }
 0x24a   : > { %v664_v7 = vpop.permute.xlu0 %663 }
 0x24b   : > { %v675_v16 = vsel %vm673_vm5, %v662_v6, %v664_v7  ;;  %v907_v6 = vld [vmem:[%s1665_s7] sm:$0xff] }
 0x24d   : > { %v666_v8 = vpop.permute.xlu1 %665 }
 0x24e   : > { %v668_v9 = vpop.permute.xlu0 %667 }
 0x24f   : > { %v676_v13 = vsel %vm673_vm5, %v666_v8, %v668_v9  ;;  %v1005_v8 = vld [vmem:[%s1667_s9 + $0x8] sm:$0xff] }
 0x251   : > { %v670_v10 = vpop.permute.xlu1 %669 }
 0x252   : > { %v672_v11 = vpop.permute.xlu0 %671 }
 0x253   : > { %735 = vmatprep.subr.mxu1 %v672_v11  ;;  %v677_v12 = vsel %vm673_vm5, %v670_v10, %v672_v11 }
 0x254   : > { %736 = vmatpush1.msra.mxu1 %v677_v12 }
 0x255   : > { %737 = vmatprep.subr.mxu1 %v668_v9  ;;  %v638_v14 = vpop.permute.xlu1 %637 }
 0x256   : > { %v640_v15 = vpop.permute.xlu0 %639  ;;  %738 = vmatpush1.msra.mxu1 %v676_v13 }
 0x257   : > { %739 = vmatprep.subr.mxu1 %v664_v7  ;;  %v647_v21 = vsel %vm434_vm0, %v638_v14, %v640_v15  ;;  %v1004_v7 = vld [vmem:[%s1667_s9] sm:$0xff] }
 0x258   : > { %740 = vmatpush1.msra.mxu1 %v675_v16 }
 0x259   : > { %741 = vmatprep.subr.mxu1 %v660_v5  ;;  %v642_v18 = vpop.permute.xlu1 %641  ;;  %v908_v5 = vld [vmem:[%s1665_s7 + $0x8] sm:$0xff] }
 0x25a   : > { %v644_v19 = vpop.permute.xlu0 %643  ;;  %742 = vmatpush1.msra.mxu1 %v674_v17 }
 0x25b   : > { %743 = vmatprep.subr.mxu1 %v644_v19  ;;  %v648_v20 = vsel %vm434_vm0, %v642_v18, %v644_v19 }
 0x25c   : > { %744 = vmatpush1.msra.mxu1 %v648_v20 }
 0x25d   : > { %745 = vmatprep.subr.mxu1 %v640_v15  ;;  %v634_v22 = vpop.permute.xlu1 %633 }
 0x25e   : > { %v636_v23 = vpop.permute.xlu0 %635  ;;  %746 = vmatpush1.msra.mxu1 %v647_v21 }
 0x25f   : > { %747 = vmatprep.subr.mxu1 %v636_v23  ;;  %v646_v24 = vsel %vm434_vm0, %v634_v22, %v636_v23 }
 0x260   : > { %748 = vmatpush1.msra.mxu1 %v646_v24 }
 0x261   : > { %v630_v25 = vpop.permute.xlu1 %629 }
 0x262   : > { %v632_v26 = vpop.permute.xlu0 %631 }
 0x263   : > { %749 = vmatprep.subr.mxu1 %v632_v26  ;;  %v645_v27 = vsel %vm434_vm0, %v630_v25, %v632_v26 }
 0x264   : > { %750 = vmatpush1.msra.mxu1 %v645_v27 }
 0x265   : > { %751 = vmatprep.subr.mxu1 %v620_v62 }
 0x266   : > { %752 = vmatpush1.msra.mxu1 %v619_v61 }
 0x267   : > { %753 = vmatprep.subr.mxu1 %v1506_v60 }
 0x268   : > { %754 = vmatpush1.msra.mxu1 %v1502_v59 }
 0x269   : > { %755 = vmatprep.subr.mxu1 %v1497_v58 }
 0x26a   : > { %756 = vmatpush1.msra.mxu1 %v1491_v57 }
 0x26b   : > { %757 = vmatprep.subr.mxu1 %v1486_v53 }
 0x26c   : > { %758 = vmatpush1.msra.mxu1 %v1480_v51 }
 0x26d   : > { %1220 = vmatmul.mubr.msk.f32.vlgmr.msra.gmra.mxu1 %vm714_vm6, %v686_v28 }
 0x26e   : > { %797 = vmatprep.mubr.f32.mxu1 %v1352_v4  ;;  %v712_v33 = vpop.permute.xlu1 %711 }
 0x26f   : > { %v707_v32 = vpop.permute.xlu0 %706 }
 0x271   : > { %1221 = vmatmul.mubr.msk.f32.gmra.mxu1 %vm714_vm6, %v687_v29 }
 0x272   : > { %803 = vmatprep.mubr.f32.mxu1 %v1352_v4  ;;  %v702_v40 = vpop.permute.xlu1 %701 }
 0x273   : > { %v697_v34 = vpop.permute.xlu0 %696 }
 0x275   : > { %1222 = vmatmul.mubr.msk.f32.gmra.mxu1 %vm714_vm6, %v688_v30 }
 0x276   : > { %809 = vmatprep.mubr.f32.mxu1 %v1352_v4 }
 0x279   : > { %1223 = vmatmul.mubr.msk.f32.gmra.mxu1 %vm714_vm6, %v689_v31 }
 0x32d   : > { %v793_v35 = vpop.f32.mrf.mxu1 }
 0x32e   : > { %v794_v36 = vadd.f32 %v793_v35, %v697_v34 }
 0x32f   : > { %v795_v37 = vpop.f32.mrf.mxu1 }
 0x330   : > { %v816_v38 = vmax.f32 %v794_v36, 0.0  ;;  %v796_v39 = vadd.f32 %v795_v37, %v697_v34  ;;  %v1002_v34 = vld [vmem:[%s1666_s8] sm:$0xff] }
 0x331   : > { %v799_v41 = vpop.f32.mrf.mxu1 }
 0x332   : > { %824 = vst [vmem:[#allocation4] sm:$0xff] %v816_v38  ;;  %v817_v42 = vmax.f32 %v796_v39, 0.0  ;;  %v800_v43 = vadd.f32 %v799_v41, %v702_v40 }
 0x333   : > { %836 = vst.msk [vmem:[#allocation4] sm:$0xff] %vm825_vm7, %v1352_v4  ;;  %v801_v44 = vpop.f32.mrf.mxu1 }
 0x334   : > { %826 = vst.msk [vmem:[#allocation4 + $0x8] sm:$0xff] %vm825_vm7, %v817_v42  ;;  %v818_v45 = vmax.f32 %v800_v43, 0.0  ;;  %v802_v46 = vadd.f32 %v801_v44, %v702_v40  ;;  %v1003_v43 = vld [vmem:[%s1666_s8 + $0x8] sm:$0xff] }
 0x335   : > { %v805_v47 = vpop.f32.mrf.mxu1 }
 0x336   : > { %827 = vst [vmem:[#allocation4 + $0x10] sm:$0xff] %v818_v45  ;;  %v819_v48 = vmax.f32 %v802_v46, 0.0  ;;  %v806_v49 = vadd.f32 %v805_v47, %v707_v32 }
 0x337   : > { %837 = vst.msk [vmem:[#allocation4 + $0x10] sm:$0xff] %vm825_vm7, %v1352_v4  ;;  %v807_v50 = vpop.f32.mrf.mxu1 }
 0x338   : > { %828 = vst.msk [vmem:[#allocation4 + $0x18] sm:$0xff] %vm825_vm7, %v819_v48  ;;  %v820_v51 = vmax.f32 %v806_v49, 0.0  ;;  %v808_v52 = vadd.f32 %v807_v50, %v707_v32 }
 0x339   : > { %v811_v53 = vpop.f32.mrf.mxu1 }
 0x33a   : > { %829 = vst [vmem:[#allocation4 + $0x20] sm:$0xff] %v820_v51  ;;  %v821_v54 = vmax.f32 %v808_v52, 0.0  ;;  %v812_v55 = vadd.f32 %v811_v53, %v712_v33  ;;  %v1577_v56 = vld [vmem:[#allocation4] sm:$0xff] }
 0x33b   : > { %838 = vst.msk [vmem:[#allocation4 + $0x20] sm:$0xff] %vm825_vm7, %v1352_v4  ;;  %v813_v57 = vpop.f32.mrf.mxu1  ;;  %880 = vrot.lane.b32.xlu1 %v1577_v56, %s1356_s30  ;;  %v844_v58 = vld [vmem:[#allocation4 + $0x8] sm:$0xff] }
 0x33c   : > { %830 = vst.msk [vmem:[#allocation4 + $0x28] sm:$0xff] %vm825_vm7, %v821_v54  ;;  %v822_v59 = vmax.f32 %v812_v55, 0.0  ;;  %v814_v60 = vadd.f32 %v813_v57, %v712_v33  ;;  %882 = vrot.lane.b32.xlu0 %v844_v58, %s1356_s30  ;;  %v906_v33 = vld [vmem:[%s1664_s6 + $0x8] sm:$0xff] }
 0x33e   : > { %831 = vst [vmem:[#allocation4 + $0x30] sm:$0xff] %v822_v59  ;;  %v823_v61 = vmax.f32 %v814_v60, 0.0  ;;  %v1583_v62 = vld [vmem:[#allocation4 + $0x10] sm:$0xff] }
 0x33f   : > { %839 = vst.msk [vmem:[#allocation4 + $0x30] sm:$0xff] %vm825_vm7, %v1352_v4  ;;  %884 = vrot.lane.b32.xlu1 %v1583_v62, %s1356_s30  ;;  %v845_v63 = vld [vmem:[#allocation4 + $0x18] sm:$0xff]  ;;  %v905_v4 = vld [vmem:[%s1664_s6] sm:$0xff] }
 0x340   : > { %832 = vst.msk [vmem:[#allocation4 + $0x38] sm:$0xff] %vm825_vm7, %v823_v61  ;;  %886 = vrot.lane.b32.xlu0 %v845_v63, %s1356_s30  ;;  %1275 = vmatprep.mubr.msk.f32.mxu0 %vm714_vm6, %v905_v4 }
 0x342   : > { %v1589_v0 = vld [vmem:[#allocation4 + $0x20] sm:$0xff] }
 0x343   : > { %888 = vrot.lane.b32.xlu1 %v1589_v0, %s1356_s30  ;;  %v846_v1 = vld [vmem:[#allocation4 + $0x28] sm:$0xff] }
 0x344   : > { %890 = vrot.lane.b32.xlu0 %v846_v1, %s1356_s30 }
 0x346   : > { %v1592_v2 = vld [vmem:[#allocation4 + $0x30] sm:$0xff] }
 0x347   : > { %892 = vrot.lane.b32.xlu1 %v1592_v2, %s1356_s30  ;;  %v847_v3 = vld [vmem:[#allocation4 + $0x38] sm:$0xff] }
 0x348   : > { %894 = vrot.lane.b32.xlu0 %v847_v3, %s1356_s30 }
 0x34b   : > { %864 = vrot.lane.b32.xlu1 %v1589_v0, %s1355_s28 }
 0x34c   : > { %866 = vrot.lane.b32.xlu0 %v846_v1, %s1355_s28 }
 0x34f   : > { %868 = vrot.lane.b32.xlu1 %v1592_v2, %s1355_s28 }
 0x350   : > { %870 = vrot.lane.b32.xlu0 %v847_v3, %s1355_s28 }
 0x353   : > { %860 = vrot.lane.b32.xlu1 %v1583_v62, %s1355_s28 }
 0x354   : > { %862 = vrot.lane.b32.xlu0 %v845_v63, %s1355_s28 }
 0x357   : > { %856 = vrot.lane.b32.xlu1 %v1577_v56, %s1355_s28 }
 0x358   : > { %858 = vrot.lane.b32.xlu0 %v844_v58, %s1355_s28 }
 0x35b   : > { %916 = vperm.xlu1 %1317, %v908_v5  }
 0x35c   : > { %911 = vperm.xlu0 %1316, %v907_v6  }
 0x35f   : > { %1008 = vperm.xlu1 %1317, %v1004_v7  }
 0x360   : > { %1013 = vperm.xlu0 %1316, %v1005_v8  }
 0x3ad   : > { %v881_v9 = vpop.permute.xlu1 %880 }
 0x3ae   : > { %v883_v10 = vpop.permute.xlu0 %882 }
 0x3af   : > { %v897_v22 = vsel %vm896_vm8, %v881_v9, %v883_v10 }
 0x3b1   : > { %v885_v11 = vpop.permute.xlu1 %884 }
 0x3b2   : > { %v887_v12 = vpop.permute.xlu0 %886 }
 0x3b3   : > { %v898_v21 = vsel %vm896_vm8, %v885_v11, %v887_v12 }
 0x3b5   : > { %v889_v13 = vpop.permute.xlu1 %888 }
 0x3b6   : > { %v891_v14 = vpop.permute.xlu0 %890 }
 0x3b7   : > { %v899_v18 = vsel %vm896_vm8, %v889_v13, %v891_v14 }
 0x3b9   : > { %v893_v15 = vpop.permute.xlu1 %892 }
 0x3ba   : > { %v895_v16 = vpop.permute.xlu0 %894 }
 0x3bb   : > { %v900_v17 = vsel %vm896_vm8, %v893_v15, %v895_v16 }
 0x3bc   : > { %1251 = vmatprep.subr.mxu0 %v900_v17 }
 0x3bd   : > { %1252 = vmatpush3.msra.mxu0 %v900_v17  ;;  %v865_v19 = vpop.permute.xlu1 %864 }
 0x3be   : > { %v867_v20 = vpop.permute.xlu0 %866  ;;  %1253 = vmatprep.subr.mxu0 %v899_v18 }
 0x3bf   : > { %1254 = vmatpush3.msra.mxu0 %v899_v18  ;;  %v874_v26 = vsel %vm673_vm5, %v865_v19, %v867_v20 }
 0x3c0   : > { %1255 = vmatprep.subr.mxu0 %v898_v21 }
 0x3c1   : > { %1256 = vmatpush3.msra.mxu0 %v898_v21  ;;  %v869_v23 = vpop.permute.xlu1 %868 }
 0x3c2   : > { %v871_v24 = vpop.permute.xlu0 %870  ;;  %1257 = vmatprep.subr.mxu0 %v897_v22 }
 0x3c3   : > { %1258 = vmatpush3.msra.mxu0 %v897_v22  ;;  %v875_v25 = vsel %vm673_vm5, %v869_v23, %v871_v24 }
 0x3c4   : > { %1259 = vmatprep.subr.mxu0 %v875_v25 }
 0x3c5   : > { %1260 = vmatpush3.msra.mxu0 %v875_v25  ;;  %v861_v27 = vpop.permute.xlu1 %860 }
 0x3c6   : > { %v863_v28 = vpop.permute.xlu0 %862  ;;  %1261 = vmatprep.subr.mxu0 %v874_v26 }
 0x3c7   : > { %1262 = vmatpush3.msra.mxu0 %v874_v26  ;;  %v873_v29 = vsel %vm673_vm5, %v861_v27, %v863_v28 }
 0x3c8   : > { %1263 = vmatprep.subr.mxu0 %v873_v29 }
 0x3c9   : > { %1264 = vmatpush3.msra.mxu0 %v873_v29  ;;  %v857_v30 = vpop.permute.xlu1 %856 }
 0x3ca   : > { %v859_v31 = vpop.permute.xlu0 %858 }
 0x3cb   : > { %v872_v32 = vsel %vm673_vm5, %v857_v30, %v859_v31 }
 0x3cc   : > { %1265 = vmatprep.subr.mxu0 %v872_v32 }
 0x3cd   : > { %1266 = vmatpush3.msra.mxu0 %v872_v32 }
 0x3ce   : > { %1267 = vmatprep.subr.mxu0 %v1592_v2 }
 0x3cf   : > { %1268 = vmatpush3.msra.mxu0 %v1592_v2 }
 0x3d0   : > { %1269 = vmatprep.subr.mxu0 %v1589_v0 }
 0x3d1   : > { %1270 = vmatpush3.msra.mxu0 %v1589_v0 }
 0x3d2   : > { %1271 = vmatprep.subr.mxu0 %v1583_v62 }
 0x3d3   : > { %1272 = vmatpush3.msra.mxu0 %v1583_v62 }
 0x3d4   : > { %1273 = vmatprep.subr.mxu0 %v1577_v56 }
 0x3d5   : > { %1274 = vmatpush3.msra.mxu0 %v1577_v56 }
 0x3d6   : > { %1276 = vmatmul.mubr.msk.f32.vlgmr.msra.gmra.mxu0 %vm714_vm6, %v906_v33  ;;  %v917_v35 = vpop.permute.xlu1 %916 }
 0x3d7   : > { %1282 = vmatprep.mubr.msk.f32.mxu0 %vm1016_vm9, %v1002_v34  ;;  %v912_v38 = vpop.permute.xlu0 %911 }
 0x3da   : > { %v1009_v47 = vpop.permute.xlu1 %1008 }
 0x3db   : > { %v1014_v44 = vpop.permute.xlu0 %1013 }
 0x496   : > { %v1277_v36 = vpop.f32.mrf.mxu0 }
 0x497   : > { %v997_v37 = vadd.f32 %v1277_v36, %v917_v35 }
 0x498   : > { %v991_v39 = vpop.f32.mrf.mxu0 }
 0x499   : > { %v1001_v40 = vmax.f32 %v997_v37, 0.0  ;;  %v992_v41 = vadd.f32 %v991_v39, %v912_v38 }
 0x49b   : > { %v1000_v42 = vmax.f32 %v992_v41, 0.0  ;;  %1278 = vmatprep.subr.mxu0 %v1001_v40 }
 0x49c   : > { %1279 = vmatpush3.msra.mxu0 %v1001_v40 }
 0x49d   : > { %1280 = vmatprep.subr.mxu0 %v1000_v42 }
 0x49e   : > { %1281 = vmatpush3.msra.mxu0 %v1000_v42 }
 0x49f   : > { %1283 = vmatmul.mubr.msk.f32.vlgmr.msra.gmra.mxu0 %vm1016_vm9, %v1003_v43 }
 0x55f   : > { %v1284_v45 = vpop.f32.mrf.mxu0 }
 0x560   : > { %v1095_v46 = vadd.f32 %v1284_v45, %v1014_v44 }
 0x561   : > { %v1089_v48 = vpop.f32.mrf.mxu0 }
 0x562   : > { %v1229_v49 = vmul.f32 -1.442695, %v1095_v46  ;;  %v1090_v50 = vadd.f32 %v1089_v48, %v1009_v47 }
 0x564   : > { %1318 = vpow2.f32 %v1229_v49  ;;  %v1228_v51 = vmul.f32 -1.442695, %v1090_v50 }
 0x566   : > { %1320 = vpow2.f32 %v1228_v51 }
 0x571   : > { %v1319_v52 = vpop.eup %1318 }
 0x572   : > { %v1105_v53 = vadd.f32 1.0, %v1319_v52 }
 0x573   : > { %v1321_v54 = vpop.eup %1320 }
 0x574   : > { %1322 = vrcp.f32 %v1105_v53  ;;  %v1104_v55 = vadd.f32 1.0, %v1321_v54 }
 0x576   : > { %1324 = vrcp.f32 %v1104_v55 }
 0x581   : > { %v1323_v56 = vpop.eup %1322 }
 0x582   : > { %1111 = vst [vmem:[%s415_s18 + $0x8] sm:$0xff] %v1323_v56 }
 0x583   : > { %v1325_v57 = vpop.eup %1324 }
 0x584   : > { %1110 = vst [vmem:[%s415_s18] sm:$0xff] %v1325_v57 }
 0x585 PF: > { %s20_s15 = sadd.s32 1, %s1348_s15   ;;  %s1669_s13 = smov %s1344_s14 }
 0x586   : > { %p17_p5 = scmp.ge.s32.totalorder %s20_s15, 4   ;;  %s1670_s14 = smov %s1672_s16 }
 0x588   :  { %19 = sbr.rel (!%p17_p5) target bundleno = 2 (0x2), region = 101 }

</bundles_post_ra>
